<compile_context>
chip_gen: v7x
topology: tpu7x:2x2x1
jax: 0.10.0
libtpu: 0.0.40
codegen_flags: <defaults>
</compile_context>

<pallas_src>
import jax
import jax.numpy as jnp
from jax.experimental import pallas as pl
from jax.experimental.pallas import tpu as pltpu

N_INPUT = 44
HIDDEN_UNIT = 10
BN_EPS = 1e-5

LANES = 128      # lane width of every padded block / row
K_ROWS = 64      # contraction dim of every weight block (max real K is 64)
N_WBLOCKS = 6    # weight-atlas blocks

# Lane offsets inside the single (B, 128) output slab.
MU_OFF = 0       # mu      -> lanes [0, 10)
Z_OFF = 16       # z       -> lanes [16, 26)
LNS_OFF = 64     # lnsigma -> lanes [64, 74)
DEC_OFF = 80     # decoded -> lanes [80, 124)

# Rows of the dynamic (8 + B + 1, 128) table: 8 static bias/BN rows, B x rows, 1 eps row.
ROW_ENC_B, ROW_BN_G, ROW_BN_B = 0, 1, 2
ROW_HEAD_B1, ROW_HEAD_B2 = 3, 4
ROW_DEC_B1, ROW_DEC_B2, ROW_DEC_B3 = 5, 6, 7
N_STATIC_ROWS = 8
X_ROW_OFF = N_STATIC_ROWS        # x rows at [8, 8+B); eps row at 8+B


def vae_kernel(t_ref, w_ref, out_ref):
    H = HIDDEN_UNIT
    B = out_ref.shape[0]

    enc_b = t_ref[ROW_ENC_B:ROW_ENC_B + 1, :]
    bn_g = t_ref[ROW_BN_G:ROW_BN_G + 1, :]
    bn_b = t_ref[ROW_BN_B:ROW_BN_B + 1, :]
    hb1 = t_ref[ROW_HEAD_B1:ROW_HEAD_B1 + 1, :]
    hb2 = t_ref[ROW_HEAD_B2:ROW_HEAD_B2 + 1, :]
    db1 = t_ref[ROW_DEC_B1:ROW_DEC_B1 + 1, :]
    db2 = t_ref[ROW_DEC_B2:ROW_DEC_B2 + 1, :]
    db3 = t_ref[ROW_DEC_B3:ROW_DEC_B3 + 1, :]
    x = t_ref[X_ROW_OFF:X_ROW_OFF + B, 0:K_ROWS]          # (B, 64), lanes >= 44 are zero
    eps_r = t_ref[X_ROW_OFF + B:X_ROW_OFF + B + 1, :]     # (1, 128): eps at [0,10) and [16,26)

    # ---- encoder: Linear(44,64) -> ReLU -> BatchNorm1d(64) (training-mode batch stats)
    h = jnp.maximum(
        jnp.dot(x, w_ref[0], preferred_element_type=jnp.float32) + enc_b, 0.0)
    mean = jnp.mean(h, axis=0, keepdims=True)
    hc = h - mean                                          # hoisted; reused for var and norm
    var = jnp.mean(hc * hc, axis=0, keepdims=True)         # biased var (BN training mode)
    h = bn_g * hc * jax.lax.rsqrt(var + BN_EPS) + bn_b
    # padded lanes of h stay exactly zero (gamma/beta padding is zero).

    # ---- fused mu/lnsigma heads:
    #   layer 1: h[:, :64] @ [mu_w1 | ls_w1]              (one (64,128) matmul)
    #   layer 2: block-diag [mu_w2 ; ls_w2] with DUPLICATED columns:
    #            mu at lanes [0,10) and [16,26), lnsigma at [64,74) and [80,90)
    hs1 = jnp.maximum(
        jnp.dot(h[:, 0:K_ROWS], w_ref[1], preferred_element_type=jnp.float32) + hb1, 0.0)
    ms = jnp.dot(hs1[:, 0:K_ROWS], w_ref[2], preferred_element_type=jnp.float32) + hb2

    # ---- reparameterization in vregs: roll by 64 (direction-agnostic on 128 lanes)
    # aligns lnsigma copies onto the mu copies; eps row is zero on all other lanes.
    lns_on_mu = pltpu.roll(ms, shift=LANES - LNS_OFF, axis=1)
    z_full = eps_r * jnp.exp(lns_on_mu) + ms
    # z_full: z at [0,10) (decoder input) and [16,26) (output), lnsigma at [64,74).

    # ---- decoder: Linear(10,32) ReLU Linear(32,32) ReLU Linear(32,44) ReLU
    # last layer's weights are packed so decoded lands directly at lanes [80,124).
    d = jnp.maximum(
        jnp.dot(z_full[:, 0:K_ROWS], w_ref[3], preferred_element_type=jnp.float32) + db1, 0.0)
    d = jnp.maximum(
        jnp.dot(d[:, 0:K_ROWS], w_ref[4], preferred_element_type=jnp.float32) + db2, 0.0)
    d = jnp.maximum(
        jnp.dot(d[:, 0:K_ROWS], w_ref[5], preferred_element_type=jnp.float32) + db3, 0.0)

    # ---- compose the (B,128) output slab in vregs; single full-width store
    #   [0,16): ms (mu) | [16,80): z_full (z, lnsigma) | [80,128): d (decoded)
    lane = jax.lax.broadcasted_iota(jnp.int32, (B, LANES), 1)
    out_ref[...] = jnp.where(lane < Z_OFF, ms,
                             jnp.where(lane < DEC_OFF, z_full, d))


def init_params(key, n_input=N_INPUT, hidden_unit=HIDDEN_UNIT):
    """Deterministic PyTorch-Linear-style init: U(-1/sqrt(fan_in), 1/sqrt(fan_in))."""
    def linear(k, fan_in, fan_out):
        kw, kb = jax.random.split(k)
        bound = 1.0 / jnp.sqrt(float(fan_in))
        w = jax.random.uniform(kw, (fan_in, fan_out), jnp.float32, -bound, bound)
        b = jax.random.uniform(kb, (1, fan_out), jnp.float32, -bound, bound)
        return w, b

    ks = jax.random.split(key, 8)
    enc_w, enc_b = linear(ks[0], n_input, 64)
    bn_g = jnp.ones((1, 64), jnp.float32)
    bn_b = jnp.zeros((1, 64), jnp.float32)
    mu_w1, mu_b1 = linear(ks[1], 64, 32)
    mu_w2, mu_b2 = linear(ks[2], 32, hidden_unit)
    ls_w1, ls_b1 = linear(ks[3], 64, 32)
    ls_w2, ls_b2 = linear(ks[4], 32, hidden_unit)
    dec_w1, dec_b1 = linear(ks[5], hidden_unit, 32)
    dec_w2, dec_b2 = linear(ks[6], 32, 32)
    dec_w3, dec_b3 = linear(ks[7], 32, n_input)
    return (enc_w, enc_b, bn_g, bn_b,
            mu_w1, mu_b1, mu_w2, mu_b2,
            ls_w1, ls_b1, ls_w2, ls_b2,
            dec_w1, dec_b1, dec_w2, dec_b2, dec_w3, dec_b3)


def pack_static(params):
    """Pack ALL static parameters once: (6,64,128) weight atlas + (8,128) bias/BN table."""
    (enc_w, enc_b, bn_g, bn_b,
     mu_w1, mu_b1, mu_w2, mu_b2,
     ls_w1, ls_b1, ls_w2, ls_b2,
     dec_w1, dec_b1, dec_w2, dec_b2, dec_w3, dec_b3) = params
    H = HIDDEN_UNIT

    def pad_block(w):
        r, c = w.shape
        return jnp.zeros((K_ROWS, LANES), jnp.float32).at[:r, :c].set(w.astype(jnp.float32))

    def pad_row(v):
        v = jnp.asarray(v, jnp.float32).reshape(-1)
        return jnp.zeros((LANES,), jnp.float32).at[:v.shape[0]].set(v)

    head_w1 = jnp.concatenate([mu_w1, ls_w1], axis=1)                  # (64, 64)
    head_w2 = (jnp.zeros((K_ROWS, LANES), jnp.float32)                 # block-diag, duplicated cols
               .at[0:32, MU_OFF:MU_OFF + H].set(mu_w2)
               .at[0:32, Z_OFF:Z_OFF + H].set(mu_w2)                   # mu copy for z lanes
               .at[32:64, LNS_OFF:LNS_OFF + H].set(ls_w2)
               .at[32:64, DEC_OFF:DEC_OFF + H].set(ls_w2))             # lnsigma copy (rolled onto z lanes)
    dec_w3_blk = (jnp.zeros((K_ROWS, LANES), jnp.float32)
                  .at[0:32, DEC_OFF:DEC_OFF + N_INPUT].set(dec_w3.astype(jnp.float32)))

    W = jnp.stack([
        pad_block(enc_w),      # 0: Linear(44, 64)
        pad_block(head_w1),    # 1: fused Linear(64, 32) x2
        head_w2,               # 2: fused Linear(32, 10) x2 (duplicated mu/lnsigma columns)
        pad_block(dec_w1),     # 3: Linear(10, 32)
        pad_block(dec_w2),     # 4: Linear(32, 32)
        dec_w3_blk,            # 5: Linear(32, 44) -> decoded lands at lanes [80,124)
    ])

    head_b1 = jnp.concatenate([jnp.reshape(mu_b1, (-1,)), jnp.reshape(ls_b1, (-1,))])
    head_b2 = (jnp.zeros((LANES,), jnp.float32)
               .at[MU_OFF:MU_OFF + H].set(jnp.reshape(mu_b2, (-1,)))
               .at[Z_OFF:Z_OFF + H].set(jnp.reshape(mu_b2, (-1,)))
               .at[LNS_OFF:LNS_OFF + H].set(jnp.reshape(ls_b2, (-1,)))
               .at[DEC_OFF:DEC_OFF + H].set(jnp.reshape(ls_b2, (-1,))))
    dec_b3_row = jnp.zeros((LANES,), jnp.float32).at[DEC_OFF:DEC_OFF + N_INPUT].set(
        jnp.reshape(dec_b3, (-1,)).astype(jnp.float32))

    V = jnp.stack([
        pad_row(enc_b), pad_row(bn_g), pad_row(bn_b),
        pad_row(head_b1), head_b2,
        pad_row(dec_b1), pad_row(dec_b2), dec_b3_row,
    ])
    return W, V


@jax.jit
def vae_forward(x, eps, w_atlas, v_static):
    """Per-call path: only assembles the tiny dynamic table (x + eps) and runs the kernel."""
    B, n_in = x.shape
    H = HIDDEN_UNIT
    x_pad = jnp.zeros((B, LANES), jnp.float32).at[:, :n_in].set(x.astype(jnp.float32))
    e = jnp.reshape(eps, (-1,)).astype(jnp.float32)
    eps_row = (jnp.zeros((1, LANES), jnp.float32)
               .at[0, MU_OFF:MU_OFF + H].set(e)
               .at[0, Z_OFF:Z_OFF + H].set(e))
    table = jnp.concatenate([v_static, x_pad, eps_row], axis=0)   # (8 + B + 1, 128)

    vmem = pl.BlockSpec(memory_space=pltpu.MemorySpace.VMEM)
    slab = pl.pallas_call(
        vae_kernel,
        out_shape=jax.ShapeDtypeStruct((B, LANES), jnp.float32),
        in_specs=[vmem, vmem],
        out_specs=vmem,
    )(table, w_atlas)

    mu = slab[:, MU_OFF:MU_OFF + H]
    lnsigma = slab[:, LNS_OFF:LNS_OFF + H]
    z = slab[:, Z_OFF:Z_OFF + H]
    decoded = slab[:, DEC_OFF:DEC_OFF + N_INPUT]
    return mu, lnsigma, z, decoded


def vae_reference(x, eps, params):
    """Pure-JAX reference, identical math, unpadded params."""
    (enc_w, enc_b, bn_g, bn_b,
     mu_w1, mu_b1, mu_w2, mu_b2,
     ls_w1, ls_b1, ls_w2, ls_b2,
     dec_w1, dec_b1, dec_w2, dec_b2, dec_w3, dec_b3) = params
    h = jnp.maximum(x @ enc_w + enc_b, 0.0)
    mean = jnp.mean(h, axis=0, keepdims=True)
    var = jnp.mean((h - mean) ** 2, axis=0, keepdims=True)
    h = bn_g * (h - mean) * jax.lax.rsqrt(var + BN_EPS) + bn_b
    mu = jnp.maximum(h @ mu_w1 + mu_b1, 0.0) @ mu_w2 + mu_b2
    lns = jnp.maximum(h @ ls_w1 + ls_b1, 0.0) @ ls_w2 + ls_b2
    z = eps * jnp.exp(lns) + mu
    d = jnp.maximum(z @ dec_w1 + dec_b1, 0.0)
    d = jnp.maximum(d @ dec_w2 + dec_b2, 0.0)
    d = jnp.maximum(d @ dec_w3 + dec_b3, 0.0)
    return mu, lns, z, d


if __name__ == "__main__":
    key = jax.random.PRNGKey(0)
    k_param, k_x, k_eps = jax.random.split(key, 3)

    B = 8
    x = jax.random.normal(k_x, (B, N_INPUT), dtype=jnp.float32)
    # single N(0,1) draw of shape (1, hidden_unit), broadcast over the batch
    # (matches torch.tensor(np.random.normal(size=hidden_unit)) in the reference forward).
    eps = jax.random.normal(k_eps, (1, HIDDEN_UNIT), dtype=jnp.float32)

    params = init_params(k_param)

    # Pack static weights ONCE (cached across calls); only x / eps change per forward.
    W, V = pack_static(params)
    W, V = jax.block_until_ready((W, V))

    mu, lnsigma, z, decoded = vae_forward(x, eps, W, V)
    jax.block_until_ready((mu, lnsigma, z, decoded))

    assert mu.shape == (B, HIDDEN_UNIT)
    assert lnsigma.shape == (B, HIDDEN_UNIT)
    assert z.shape == (B, HIDDEN_UNIT)
    assert decoded.shape == (B, N_INPUT)

    # numerical sanity check against the pure-JAX reference
    r_mu, r_lns, r_z, r_dec = vae_reference(x, eps, params)
    assert jnp.allclose(mu, r_mu, atol=1e-3, rtol=1e-3)
    assert jnp.allclose(lnsigma, r_lns, atol=1e-3, rtol=1e-3)
    assert jnp.allclose(z, r_z, atol=1e-3, rtol=1e-3)
    assert jnp.allclose(decoded, r_dec, atol=1e-3, rtol=1e-3)

    print("KERNEL_OK")
</pallas_src>

<mosaic_0001>
module attributes {stable_mosaic.version = 11 : i64} {
  func.func @vae_kernel(%arg0: memref<17x128xf32, #tpu.memory_space<vmem>>, %arg1: memref<6x64x128xf32, #tpu.memory_space<vmem>>, %arg2: memref<8x128xf32, #tpu.memory_space<vmem>>) attributes {dimension_semantics = [], scalar_prefetch = 0 : i64, scratch_operands = 0 : i64, tpu.core_type = #tpu.core_type<tc>} {
    %c0 = arith.constant 0 : index
    %c0_0 = arith.constant 0 : index
    %0 = vector.load %arg0[%c0, %c0_0] : memref<17x128xf32, #tpu.memory_space<vmem>>, vector<1x128xf32>
    %c1 = arith.constant 1 : index
    %c0_1 = arith.constant 0 : index
    %1 = vector.load %arg0[%c1, %c0_1] : memref<17x128xf32, #tpu.memory_space<vmem>>, vector<1x128xf32>
    %c2 = arith.constant 2 : index
    %c0_2 = arith.constant 0 : index
    %2 = vector.load %arg0[%c2, %c0_2] : memref<17x128xf32, #tpu.memory_space<vmem>>, vector<1x128xf32>
    %c3 = arith.constant 3 : index
    %c0_3 = arith.constant 0 : index
    %3 = vector.load %arg0[%c3, %c0_3] : memref<17x128xf32, #tpu.memory_space<vmem>>, vector<1x128xf32>
    %c4 = arith.constant 4 : index
    %c0_4 = arith.constant 0 : index
    %4 = vector.load %arg0[%c4, %c0_4] : memref<17x128xf32, #tpu.memory_space<vmem>>, vector<1x128xf32>
    %c5 = arith.constant 5 : index
    %c0_5 = arith.constant 0 : index
    %5 = vector.load %arg0[%c5, %c0_5] : memref<17x128xf32, #tpu.memory_space<vmem>>, vector<1x128xf32>
    %c6 = arith.constant 6 : index
    %c0_6 = arith.constant 0 : index
    %6 = vector.load %arg0[%c6, %c0_6] : memref<17x128xf32, #tpu.memory_space<vmem>>, vector<1x128xf32>
    %c7 = arith.constant 7 : index
    %c0_7 = arith.constant 0 : index
    %7 = vector.load %arg0[%c7, %c0_7] : memref<17x128xf32, #tpu.memory_space<vmem>>, vector<1x128xf32>
    %c8 = arith.constant 8 : index
    %c0_8 = arith.constant 0 : index
    %8 = vector.load %arg0[%c8, %c0_8] : memref<17x128xf32, #tpu.memory_space<vmem>>, vector<8x64xf32>
    %c16 = arith.constant 16 : index
    %c0_9 = arith.constant 0 : index
    %9 = vector.load %arg0[%c16, %c0_9] : memref<17x128xf32, #tpu.memory_space<vmem>>, vector<1x128xf32>
    %c0_10 = arith.constant 0 : index
    %c0_11 = arith.constant 0 : index
    %c0_12 = arith.constant 0 : index
    %10 = vector.load %arg1[%c0_10, %c0_11, %c0_12] : memref<6x64x128xf32, #tpu.memory_space<vmem>>, vector<1x64x128xf32>
    %11 = vector.shape_cast %10 : vector<1x64x128xf32> to vector<64x128xf32>
    %cst = arith.constant dense<0.000000e+00> : vector<8x128xf32>
    %12 = tpu.matmul %8, %11, %cst {dimension_numbers = #tpu.dot_dimension_numbers<[1], [0], [0], [1], [0, 0, 1, 1], [], []>} : vector<8x64xf32>, vector<64x128xf32>, vector<8x128xf32> -> vector<8x128xf32>
    %13 = vector.broadcast %0 : vector<1x128xf32> to vector<8x128xf32>
    %14 = arith.addf %12, %13 : vector<8x128xf32>
    %cst_13 = arith.constant 0.000000e+00 : f32
    %15 = vector.broadcast %cst_13 : f32 to vector<8x128xf32>
    %16 = arith.maximumf %14, %15 : vector<8x128xf32>
    %cst_14 = arith.constant dense<0.000000e+00> : vector<128xf32>
    %17 = vector.multi_reduction <add>, %16, %cst_14 [0] : vector<8x128xf32> to vector<128xf32>
    %18 = vector.shape_cast %17 : vector<128xf32> to vector<1x128xf32>
    %cst_15 = arith.constant 8.000000e+00 : f32
    %19 = vector.broadcast %cst_15 : f32 to vector<1x128xf32>
    %20 = arith.divf %18, %19 : vector<1x128xf32>
    %21 = vector.broadcast %20 : vector<1x128xf32> to vector<8x128xf32>
    %22 = arith.subf %16, %21 : vector<8x128xf32>
    %23 = arith.mulf %22, %22 : vector<8x128xf32>
    %cst_16 = arith.constant dense<0.000000e+00> : vector<128xf32>
    %24 = vector.multi_reduction <add>, %23, %cst_16 [0] : vector<8x128xf32> to vector<128xf32>
    %25 = vector.shape_cast %24 : vector<128xf32> to vector<1x128xf32>
    %cst_17 = arith.constant 8.000000e+00 : f32
    %26 = vector.broadcast %cst_17 : f32 to vector<1x128xf32>
    %27 = arith.divf %25, %26 : vector<1x128xf32>
    %28 = vector.broadcast %1 : vector<1x128xf32> to vector<8x128xf32>
    %29 = arith.mulf %28, %22 : vector<8x128xf32>
    %cst_18 = arith.constant 9.99999974E-6 : f32
    %30 = vector.broadcast %cst_18 : f32 to vector<1x128xf32>
    %31 = arith.addf %27, %30 : vector<1x128xf32>
    %32 = math.rsqrt %31 : vector<1x128xf32>
    %33 = vector.broadcast %32 : vector<1x128xf32> to vector<8x128xf32>
    %34 = arith.mulf %29, %33 : vector<8x128xf32>
    %35 = vector.broadcast %2 : vector<1x128xf32> to vector<8x128xf32>
    %36 = arith.addf %34, %35 : vector<8x128xf32>
    %37 = vector.extract_strided_slice %36 {offsets = [0, 0], sizes = [8, 64], strides = [1, 1]} : vector<8x128xf32> to vector<8x64xf32>
    %c1_19 = arith.constant 1 : index
    %c0_20 = arith.constant 0 : index
    %c0_21 = arith.constant 0 : index
    %38 = vector.load %arg1[%c1_19, %c0_20, %c0_21] : memref<6x64x128xf32, #tpu.memory_space<vmem>>, vector<1x64x128xf32>
    %39 = vector.shape_cast %38 : vector<1x64x128xf32> to vector<64x128xf32>
    %cst_22 = arith.constant dense<0.000000e+00> : vector<8x128xf32>
    %40 = tpu.matmul %37, %39, %cst_22 {dimension_numbers = #tpu.dot_dimension_numbers<[1], [0], [0], [1], [0, 0, 1, 1], [], []>} : vector<8x64xf32>, vector<64x128xf32>, vector<8x128xf32> -> vector<8x128xf32>
    %41 = vector.broadcast %3 : vector<1x128xf32> to vector<8x128xf32>
    %42 = arith.addf %40, %41 : vector<8x128xf32>
    %cst_23 = arith.constant 0.000000e+00 : f32
    %43 = vector.broadcast %cst_23 : f32 to vector<8x128xf32>
    %44 = arith.maximumf %42, %43 : vector<8x128xf32>
    %45 = vector.extract_strided_slice %44 {offsets = [0, 0], sizes = [8, 64], strides = [1, 1]} : vector<8x128xf32> to vector<8x64xf32>
    %c2_24 = arith.constant 2 : index
    %c0_25 = arith.constant 0 : index
    %c0_26 = arith.constant 0 : index
    %46 = vector.load %arg1[%c2_24, %c0_25, %c0_26] : memref<6x64x128xf32, #tpu.memory_space<vmem>>, vector<1x64x128xf32>
    %47 = vector.shape_cast %46 : vector<1x64x128xf32> to vector<64x128xf32>
    %cst_27 = arith.constant dense<0.000000e+00> : vector<8x128xf32>
    %48 = tpu.matmul %45, %47, %cst_27 {dimension_numbers = #tpu.dot_dimension_numbers<[1], [0], [0], [1], [0, 0, 1, 1], [], []>} : vector<8x64xf32>, vector<64x128xf32>, vector<8x128xf32> -> vector<8x128xf32>
    %49 = vector.broadcast %4 : vector<1x128xf32> to vector<8x128xf32>
    %50 = arith.addf %48, %49 : vector<8x128xf32>
    %c64_i32 = arith.constant 64 : i32
    %51 = tpu.dynamic_rotate %50 by %c64_i32 dim 1 : vector<8x128xf32>, i32 -> vector<8x128xf32>
    %52 = math.exp %51 : vector<8x128xf32>
    %53 = vector.broadcast %9 : vector<1x128xf32> to vector<8x128xf32>
    %54 = arith.mulf %53, %52 : vector<8x128xf32>
    %55 = arith.addf %54, %50 : vector<8x128xf32>
    %56 = vector.extract_strided_slice %55 {offsets = [0, 0], sizes = [8, 64], strides = [1, 1]} : vector<8x128xf32> to vector<8x64xf32>
    %c3_28 = arith.constant 3 : index
    %c0_29 = arith.constant 0 : index
    %c0_30 = arith.constant 0 : index
    %57 = vector.load %arg1[%c3_28, %c0_29, %c0_30] : memref<6x64x128xf32, #tpu.memory_space<vmem>>, vector<1x64x128xf32>
    %58 = vector.shape_cast %57 : vector<1x64x128xf32> to vector<64x128xf32>
    %cst_31 = arith.constant dense<0.000000e+00> : vector<8x128xf32>
    %59 = tpu.matmul %56, %58, %cst_31 {dimension_numbers = #tpu.dot_dimension_numbers<[1], [0], [0], [1], [0, 0, 1, 1], [], []>} : vector<8x64xf32>, vector<64x128xf32>, vector<8x128xf32> -> vector<8x128xf32>
    %60 = vector.broadcast %5 : vector<1x128xf32> to vector<8x128xf32>
    %61 = arith.addf %59, %60 : vector<8x128xf32>
    %cst_32 = arith.constant 0.000000e+00 : f32
    %62 = vector.broadcast %cst_32 : f32 to vector<8x128xf32>
    %63 = arith.maximumf %61, %62 : vector<8x128xf32>
    %64 = vector.extract_strided_slice %63 {offsets = [0, 0], sizes = [8, 64], strides = [1, 1]} : vector<8x128xf32> to vector<8x64xf32>
    %c4_33 = arith.constant 4 : index
    %c0_34 = arith.constant 0 : index
    %c0_35 = arith.constant 0 : index
    %65 = vector.load %arg1[%c4_33, %c0_34, %c0_35] : memref<6x64x128xf32, #tpu.memory_space<vmem>>, vector<1x64x128xf32>
    %66 = vector.shape_cast %65 : vector<1x64x128xf32> to vector<64x128xf32>
    %cst_36 = arith.constant dense<0.000000e+00> : vector<8x128xf32>
    %67 = tpu.matmul %64, %66, %cst_36 {dimension_numbers = #tpu.dot_dimension_numbers<[1], [0], [0], [1], [0, 0, 1, 1], [], []>} : vector<8x64xf32>, vector<64x128xf32>, vector<8x128xf32> -> vector<8x128xf32>
    %68 = vector.broadcast %6 : vector<1x128xf32> to vector<8x128xf32>
    %69 = arith.addf %67, %68 : vector<8x128xf32>
    %cst_37 = arith.constant 0.000000e+00 : f32
    %70 = vector.broadcast %cst_37 : f32 to vector<8x128xf32>
    %71 = arith.maximumf %69, %70 : vector<8x128xf32>
    %72 = vector.extract_strided_slice %71 {offsets = [0, 0], sizes = [8, 64], strides = [1, 1]} : vector<8x128xf32> to vector<8x64xf32>
    %c5_38 = arith.constant 5 : index
    %c0_39 = arith.constant 0 : index
    %c0_40 = arith.constant 0 : index
    %73 = vector.load %arg1[%c5_38, %c0_39, %c0_40] : memref<6x64x128xf32, #tpu.memory_space<vmem>>, vector<1x64x128xf32>
    %74 = vector.shape_cast %73 : vector<1x64x128xf32> to vector<64x128xf32>
    %cst_41 = arith.constant dense<0.000000e+00> : vector<8x128xf32>
    %75 = tpu.matmul %72, %74, %cst_41 {dimension_numbers = #tpu.dot_dimension_numbers<[1], [0], [0], [1], [0, 0, 1, 1], [], []>} : vector<8x64xf32>, vector<64x128xf32>, vector<8x128xf32> -> vector<8x128xf32>
    %76 = vector.broadcast %7 : vector<1x128xf32> to vector<8x128xf32>
    %77 = arith.addf %75, %76 : vector<8x128xf32>
    %cst_42 = arith.constant 0.000000e+00 : f32
    %78 = vector.broadcast %cst_42 : f32 to vector<8x128xf32>
    %79 = arith.maximumf %77, %78 : vector<8x128xf32>
    %80 = tpu.iota {dimensions = array<i32: 1>} : vector<8x128xi32>
    %c16_i32 = arith.constant 16 : i32
    %81 = vector.broadcast %c16_i32 : i32 to vector<8x128xi32>
    %82 = arith.cmpi slt, %80, %81 : vector<8x128xi32>
    %c80_i32 = arith.constant 80 : i32
    %83 = vector.broadcast %c80_i32 : i32 to vector<8x128xi32>
    %84 = arith.cmpi slt, %80, %83 : vector<8x128xi32>
    %85 = arith.select %84, %55, %79 : vector<8x128xi1>, vector<8x128xf32>
    %86 = arith.select %82, %50, %85 : vector<8x128xi1>, vector<8x128xf32>
    %c0_43 = arith.constant 0 : index
    %c0_44 = arith.constant 0 : index
    %87 = vector.load %arg2[%c0_43, %c0_44] : memref<8x128xf32, #tpu.memory_space<vmem>>, vector<8x128xf32>
    tpu.vector_store %arg2[%c0_43, %c0_44], %86 {strides = array<i32>} : memref<8x128xf32, #tpu.memory_space<vmem>>, vector<8x128xf32>,
    return
  }
}

</mosaic_0001>

<bundles_post_ra>
// kernel: vae_forward.1
= control target key start
LH: loop header
LB: loop body
LE: loop exit
PB: predicated region body
PF: predicated region fallthrough
CT: control target
= control target key end

     0   :  { %7 = vsyncpa [#allocation3], 0  ;;  %s898_s9 = smov [#allocation2]   ;;  %s1012_s0 = inlined_call_operand.vmem [shape: f32[17,128], index: 0, kind: input, shape index: {}]   ;;  %s1013_s1 = inlined_call_operand.hbm [shape: f32[6,64,128], index: 1, kind: input, shape index: {}]   ;;  %s1014_s2 = inlined_call_operand.vmem [shape: f32[8,128], index: 2, kind: output, shape index: {}]  }
   0x1   :  { %s15_s10 = sshll.u32 %s898_s9, 4  ;;  %s874_s13 = scalar_lea.hbm %s1013_s1, 6144  ;;  %s16_s10 = int_to_ptr.vmem [resolvable:$true] %s15_s10 }
   0x2   :  { %p875_p0 = scmp.ne.s32.totalorder %s1013_s1, %s874_s13  ;;  %p878_p1 = scmp.lt.u32.totalorder %s874_s13, %s1013_s1 }
   0x4   :  { %p880_p2 = pnand %p878_p1, %p875_p0 }
   0x6   :  { %883 = shalt.err (!%p880_p2)
}
   0x7   :  { %s884_s18 = scalar_lea.vmem %s16_s10, 6144  ;;  %p889_p4 = scmp.lt.s32.totalorder %s16_s10, %s16_s10 }
   0x8   :  { %p885_p3 = scmp.ne.s32.totalorder %s16_s10, %s884_s18  ;;  %p890_p5 = scmp.lt.s32.totalorder %s884_s18, %s884_s18 }
   0xa   :  { %p891_p6 = por %p890_p5, %p889_p4 }
   0xc   :  { %p892_p7 = pnand %p891_p6, %p885_p3 }
   0xe   :  { %895 = shalt.err (!%p892_p7)
}
   0xf   :  { %s899_s19 = smov 128   ;;  %s900_s20 = smov 8  }
  0x10   :  { %21 = dma.hbm_to_vmem [thread:$0]  %s1013_s1, 6144, %s16_s10, [#allocation3], %s899_s19, %s899_s19, %s900_s20  }
  0x11   :  { %896 = dma.done.wait [#allocation3], 6144  }
  0x12   :  { %897 = vsyncadd [#allocation3], 4294961152  ;;  %v901_v0 = vmov 0.0|0.0   ;;  %vm902_vm0 = vmmov 0   ;;  %v903_v1 = vmov 0.0   ;;  %v35_v2 = vld [vmem:[#allocation2] sm:$0xff] }
  0x13   :  { %791 = vmatprep.subr.bf16.mxu0 %v901_v0  ;;  %693 = vmatprep.mubr.msk.f32.mxu0 %vm902_vm0, %v903_v1  ;;  %v36_v3 = vld [vmem:[#allocation2 + $0x8] sm:$0xff]  ;;  %v37_v4 = vld [vmem:[#allocation2 + $0x10] sm:$0xff]  ;;  %v38_v6 = vld [vmem:[#allocation2 + $0x18] sm:$0xff]  ;;  %vm47_vm1 = vcmask 523264   ;;  %s904_s6 = smov 64  }
  0x14   :  { %803 = vmatprep.subr.bf16.mxu1 %v901_v0  ;;  %712 = vmatprep.mubr.msk.f32.mxu1 %vm902_vm0, %v903_v1  ;;  %v792_v5 = vpack.c.bf16 %v36_v3, %v35_v2  ;;  %v795_v7 = vpack.c.bf16 %v38_v6, %v37_v4  ;;  %v39_v8 = vld [vmem:[#allocation2 + $0x20] sm:$0xff]  ;;  %v40_v9 = vld [vmem:[#allocation2 + $0x28] sm:$0xff]  ;;  %v41_v11 = vld [vmem:[#allocation2 + $0x30] sm:$0xff] }
  0x15   :  { %v798_v10 = vpack.c.bf16 %v40_v9, %v39_v8  ;;  %v42_v12 = vld [vmem:[#allocation2 + $0x38] sm:$0xff]  ;;  %v33_v14 = vld [vmem:[%s1012_s0 + $0x8] sm:$0xff]  ;;  %v153_v15 = vld [vmem:[#allocation2 + $0x40] sm:$0xff] }
  0x16   :  { %793 = vmatpush3.bf16.msra.mxu0 %v792_v5  ;;  %v801_v13 = vpack.c.bf16 %v42_v12, %v41_v11  ;;  %v154_v16 = vld [vmem:[#allocation2 + $0x48] sm:$0xff]  ;;  %v155_v18 = vld [vmem:[#allocation2 + $0x50] sm:$0xff]  ;;  %v156_v19 = vld [vmem:[#allocation2 + $0x58] sm:$0xff] }
  0x17   :  { %794 = vmatprep.subr.bf16.mxu0 %v901_v0  ;;  %v804_v17 = vpack.c.bf16 %v154_v16, %v153_v15  ;;  %v807_v20 = vpack.c.bf16 %v156_v19, %v155_v18  ;;  %v157_v21 = vld [vmem:[#allocation2 + $0x60] sm:$0xff]  ;;  %v158_v22 = vld [vmem:[#allocation2 + $0x68] sm:$0xff]  ;;  %v159_v24 = vld [vmem:[#allocation2 + $0x70] sm:$0xff] }
  0x18   :  { %v810_v23 = vpack.c.bf16 %v158_v22, %v157_v21  ;;  %v160_v25 = vld [vmem:[#allocation2 + $0x78] sm:$0xff]  ;;  %v240_v27 = vld [vmem:[#allocation2 + $0x80] sm:$0xff]  ;;  %v241_v28 = vld [vmem:[#allocation2 + $0x88] sm:$0xff] }
  0x19   :  { %805 = vmatpush3.bf16.msra.mxu1 %v804_v17  ;;  %v813_v26 = vpack.c.bf16 %v160_v25, %v159_v24  ;;  %v242_v29 = vld [vmem:[#allocation2 + $0x90] sm:$0xff]  ;;  %v816_v30 = vpack.c.bf16 %v241_v28, %v240_v27  ;;  %v243_v31 = vld [vmem:[#allocation2 + $0x98] sm:$0xff]  ;;  %v244_v33 = vld [vmem:[#allocation2 + $0xa0] sm:$0xff] }
  0x1a   :  { %796 = vmatpush3.bf16.msra.mxu0 %v795_v7  ;;  %806 = vmatprep.subr.bf16.mxu1 %v901_v0  ;;  %v819_v32 = vpack.c.bf16 %v243_v31, %v242_v29  ;;  %v245_v34 = vld [vmem:[#allocation2 + $0xa8] sm:$0xff]  ;;  %v608_v36 = vld [vmem:[%s1012_s0] ss:$0 sm:$0xff]  ;;  %v610_v58 = vld [vmem:[%s1012_s0 + $0x1] ss:$0 sm:$0xff] }
  0x1b   :  { %797 = vmatprep.subr.bf16.mxu0 %v901_v0  ;;  %v822_v35 = vpack.c.bf16 %v245_v34, %v244_v33  ;;  %v611_v61 = vld [vmem:[%s1012_s0 + $0x2] ss:$0 sm:$0xff]  ;;  %v246_v2 = vld [vmem:[#allocation2 + $0xb0] sm:$0xff]  ;;  %v247_v3 = vld [vmem:[#allocation2 + $0xb8] sm:$0xff] }
  0x1c   :  { %v825_v4 = vpack.c.bf16 %v247_v3, %v246_v2  ;;  %v612_v5 = vld [vmem:[%s1012_s0 + $0x3] ss:$0 sm:$0xff]  ;;  %v337_v11 = vld [vmem:[#allocation2 + $0xc8] sm:$0xff]  ;;  %v614_v18 = vld [vmem:[%s1012_s0 + $0x4] ss:$0 sm:$0xff]  ;;  %v596_v2 = vlaneseq }
  0x1d   :  { %808 = vmatpush3.bf16.msra.mxu1 %v807_v20  ;;  %v340_v16 = vld [vmem:[#allocation2 + $0xe0] sm:$0xff]  ;;  %v341_v17 = vld [vmem:[#allocation2 + $0xe8] sm:$0xff]  ;;  %v343_v24 = vld [vmem:[#allocation2 + $0xf8] sm:$0xff] }
  0x1e   :  { %799 = vmatpush3.bf16.msra.mxu0 %v798_v10  ;;  %809 = vmatprep.subr.bf16.mxu1 %v901_v0  ;;  %v336_v10 = vld [vmem:[#allocation2 + $0xc0] sm:$0xff]  ;;  %v834_v19 = vpack.c.bf16 %v341_v17, %v340_v16  ;;  %v424_v27 = vld [vmem:[#allocation2 + $0x108] sm:$0xff]  ;;  %v425_v28 = vld [vmem:[#allocation2 + $0x110] sm:$0xff] }
  0x1f   :  { %800 = vmatprep.subr.bf16.mxu0 %v901_v0  ;;  %v828_v12 = vpack.c.bf16 %v337_v11, %v336_v10  ;;  %v428_v33 = vld [vmem:[#allocation2 + $0x128] sm:$0xff]  ;;  %v621_v3 = vld [vmem:[%s1012_s0 + $0x7] ss:$0 sm:$0xff] }
  0x21   :  { %811 = vmatpush3.bf16.msra.mxu1 %v810_v23  ;;  %v342_v23 = vld [vmem:[#allocation2 + $0xf0] sm:$0xff] }
  0x22   :  { %802 = vmatpush3.bf16.msra.mxu0 %v801_v13  ;;  %812 = vmatprep.subr.bf16.mxu1 %v901_v0  ;;  %v338_v13 = vld [vmem:[#allocation2 + $0xd0] sm:$0xff]  ;;  %v837_v25 = vpack.c.bf16 %v343_v24, %v342_v23 }
  0x23   :  { %815 = vmatprep.subr.bf16.mxu0 %v901_v0 }
  0x25   :  { %694 = vmatmul.mubr.msk.f32.vlgmr.msra.gmra.mrb[0].mxu0 %vm47_vm1, %v33_v14  ;;  %814 = vmatpush3.bf16.msra.mxu1 %v813_v26  ;;  %v339_v14 = vld [vmem:[#allocation2 + $0xd8] sm:$0xff]  ;;  %v423_v26 = vld [vmem:[#allocation2 + $0x100] sm:$0xff] }
  0x26   :  { %731 = vmatprep.mubr.msk.f32.mxu0 %vm902_vm0, %v903_v1  ;;  %827 = vmatprep.subr.bf16.mxu1 %v901_v0  ;;  %v831_v15 = vpack.c.bf16 %v339_v14, %v338_v13  ;;  %v840_v29 = vpack.c.bf16 %v424_v27, %v423_v26 }
  0x27   :  { %817 = vmatpush3.bf16.msra.mxu0 %v816_v30  ;;  %v426_v30 = vld [vmem:[#allocation2 + $0x118] sm:$0xff] }
  0x28   :  { %818 = vmatprep.subr.bf16.mxu0 %v901_v0  ;;  %v843_v31 = vpack.c.bf16 %v426_v30, %v425_v28 }
  0x2b   :  { %820 = vmatpush3.bf16.msra.mxu0 %v819_v32  ;;  %v427_v32 = vld [vmem:[#allocation2 + $0x120] sm:$0xff] }
  0x2c   :  { %821 = vmatprep.subr.bf16.mxu0 %v901_v0  ;;  %v846_v34 = vpack.c.bf16 %v428_v33, %v427_v32 }
  0x2f   :  { %823 = vmatpush3.bf16.msra.mxu0 %v822_v35 }
  0x30   :  { %824 = vmatprep.subr.bf16.mxu0 %v901_v0 }
  0x33   :  { %826 = vmatpush3.bf16.msra.mxu0 %v825_v4  ;;  %v597_v4 = vand.u32 127, %v596_v2 }
  0x34   :  { %839 = vmatprep.subr.bf16.mxu0 %v901_v0 }
  0x35   :  { %vm599_vm2 = vcmp.lt.s32.totalorder %v597_v4, 80  ;;  %vm598_vm3 = vcmp.lt.s32.totalorder %v597_v4, 16 }
  0xf8   :  { %v117_v37 = vpop.f32.mrb[0].mxu0 }
  0xf9   :  { %v118_v38 = vadd.f32 %v608_v36, %v117_v37  ;;  %v695_v39 = vpop.f32.mrb[1].mxu0  ;;  %v616_v37 = vld [vmem:[%s1012_s0 + $0x10] ss:$0 sm:$0xff] }
  0xfb   :  { %v121_v40 = vmax.f32 %v118_v38, 0.0 }
  0xfd   :  { %v122_v41 = vrot.slane %v121_v40, 4 }
  0xff   :  { %v123_v42 = vadd.f32 %v122_v41, %v121_v40  ;;  %v429_v41 = vld [vmem:[#allocation2 + $0x130] sm:$0xff] }
 0x101   :  { %v124_v43 = vrot.slane %v123_v42, 2 }
 0x103   :  { %v125_v44 = vadd.f32 %v124_v43, %v123_v42  ;;  %v430_v42 = vld [vmem:[#allocation2 + $0x138] sm:$0xff] }
 0x104   :  { %v849_v43 = vpack.c.bf16 %v430_v42, %v429_v41 }
 0x105   :  { %v126_v45 = vrot.slane %v125_v44, 1 }
 0x107   :  { %v127_v46 = vadd.f32 %v126_v45, %v125_v44  ;;  %v510_v44 = vld [vmem:[#allocation2 + $0x140] sm:$0xff]  ;;  %v511_v45 = vld [vmem:[#allocation2 + $0x148] sm:$0xff] }
 0x109   :  { %v129_v47 = vmul.f32 0.125, %v127_v46  ;;  %v512_v46 = vld [vmem:[#allocation2 + $0x150] sm:$0xff] }
 0x10b   :  { %v130_v48 = vsub.f32 %v121_v40, %v129_v47  ;;  %v852_v47 = vpack.c.bf16 %v511_v45, %v510_v44 }
 0x10d   :  { %v131_v49 = vmul.f32 %v130_v48, %v130_v48  ;;  %v143_v59 = vmul.f32 %v610_v58, %v130_v48  ;;  %v513_v48 = vld [vmem:[#allocation2 + $0x158] sm:$0xff] }
 0x10e   :  { %v517_v58 = vld [vmem:[#allocation2 + $0x178] sm:$0xff] }
 0x10f   :  { %v132_v50 = vrot.slane %v131_v49, 4 }
 0x111   :  { %v133_v51 = vadd.f32 %v132_v50, %v131_v49  ;;  %v855_v49 = vpack.c.bf16 %v513_v48, %v512_v46  ;;  %v514_v50 = vld [vmem:[#allocation2 + $0x160] sm:$0xff] }
 0x113   :  { %v134_v52 = vrot.slane %v133_v51, 2 }
 0x115   :  { %v135_v53 = vadd.f32 %v134_v52, %v133_v51  ;;  %v515_v51 = vld [vmem:[#allocation2 + $0x168] sm:$0xff] }
 0x116   :  { %v858_v52 = vpack.c.bf16 %v515_v51, %v514_v50 }
 0x117   :  { %v136_v54 = vrot.slane %v135_v53, 1 }
 0x119   :  { %v137_v55 = vadd.f32 %v136_v54, %v135_v53 }
 0x11b   :  { %v138_v56 = vmul.f32 0.125, %v137_v55 }
 0x11d   :  { %v144_v57 = vadd.f32 1e-05, %v138_v56 }
 0x11f   :  { %870 = vrsqrt.f32 %v144_v57  ;;  %v516_v57 = vld [vmem:[#allocation2 + $0x170] sm:$0xff] }
 0x129   :  { %v871_v60 = vpop.eup %870 }
 0x12a   :  { %v146_v62 = vmul.f32 %v871_v60, %v143_v59  ;;  %v861_v59 = vpack.c.bf16 %v517_v58, %v516_v57  ;;  %v619_v60 = vld [vmem:[%s1012_s0 + $0x6] ss:$0 sm:$0xff] }
 0x12c   :  { %v151_v63 = vadd.f32 %v611_v61, %v146_v62 }
 0x12e   :  { %713 = vmatmul.mubr.msk.f32.vlgmr.msra.gmra.mrb[0].mxu1 %vm47_vm1, %v151_v63 }
 0x12f   :  { %750 = vmatprep.mubr.msk.f32.mxu1 %vm902_vm0, %v903_v1  ;;  %829 = vmatpush3.bf16.msra.mxu1 %v828_v12 }
 0x130   :  { %830 = vmatprep.subr.bf16.mxu1 %v901_v0 }
 0x133   :  { %832 = vmatpush3.bf16.msra.mxu1 %v831_v15 }
 0x134   :  { %833 = vmatprep.subr.bf16.mxu1 %v901_v0 }
 0x137   :  { %835 = vmatpush3.bf16.msra.mxu1 %v834_v19 }
 0x138   :  { %836 = vmatprep.subr.bf16.mxu1 %v901_v0 }
 0x13b   :  { %838 = vmatpush3.bf16.msra.mxu1 %v837_v25 }
 0x13c   :  { %851 = vmatprep.subr.bf16.mxu1 %v901_v0 }
 0x201   :  { %v234_v6 = vpop.f32.mrb[0].mxu1 }
 0x202   :  { %v235_v7 = vadd.f32 %v612_v5, %v234_v6  ;;  %v714_v8 = vpop.f32.mrb[1].mxu1 }
 0x204   :  { %v238_v9 = vmax.f32 %v235_v7, 0.0 }
 0x206   :  { %732 = vmatmul.mubr.msk.f32.vlgmr.msra.gmra.mrb[2].mxu0 %vm47_vm1, %v238_v9 }
 0x207   :  { %769 = vmatprep.mubr.msk.f32.mxu0 %vm902_vm0, %v903_v1  ;;  %841 = vmatpush3.bf16.msra.mxu0 %v840_v29 }
 0x208   :  { %842 = vmatprep.subr.bf16.mxu0 %v901_v0 }
 0x20b   :  { %844 = vmatpush3.bf16.msra.mxu0 %v843_v31 }
 0x20c   :  { %845 = vmatprep.subr.bf16.mxu0 %v901_v0 }
 0x20f   :  { %847 = vmatpush3.bf16.msra.mxu0 %v846_v34 }
 0x210   :  { %848 = vmatprep.subr.bf16.mxu0 %v901_v0 }
 0x213   :  { %850 = vmatpush3.bf16.msra.mxu0 %v849_v43 }
 0x2d9   :  { %v321_v20 = vpop.f32.mrb[2].mxu0 }
 0x2da   :  { %v979_v21 = vadd.f32 %v614_v18, %v321_v20  ;;  %v733_v22 = vpop.f32.mrb[3].mxu0 }
 0x2dc   :  { %325 = vrot.lane.b32.xlu0 %v979_v21, %s904_s6 }
 0x34e   :  { %v326_v35 = vpop.permute.xlu0 %325 }
 0x34f   :  { %v327_v36 = vmul.f32 1.442695, %v326_v35 }
 0x351   :  { %872 = vpow2.f32 %v327_v36 }
 0x35b   :  { %v873_v38 = vpop.eup %872 }
 0x35c   :  { %v333_v39 = vmul.f32 %v873_v38, %v616_v37 }
 0x35e   :  { %v334_v40 = vadd.f32 %v333_v39, %v979_v21 }
 0x360   :  { %751 = vmatmul.mubr.msk.f32.vlgmr.msra.gmra.mrb[2].mxu1 %vm47_vm1, %v334_v40 }
 0x361   :  { %788 = vmatprep.mubr.msk.f32.mxu1 %vm902_vm0, %v903_v1  ;;  %853 = vmatpush3.bf16.msra.mxu1 %v852_v47  ;;  %v617_v1 = vld [vmem:[%s1012_s0 + $0x5] ss:$0 sm:$0xff] }
 0x362   :  { %854 = vmatprep.subr.bf16.mxu1 %v901_v0 }
 0x365   :  { %856 = vmatpush3.bf16.msra.mxu1 %v855_v49 }
 0x366   :  { %857 = vmatprep.subr.bf16.mxu1 %v901_v0 }
 0x369   :  { %859 = vmatpush3.bf16.msra.mxu1 %v858_v52 }
 0x36a   :  { %860 = vmatprep.subr.bf16.mxu1 %v901_v0 }
 0x36d   :  { %862 = vmatpush3.bf16.msra.mxu1 %v861_v59 }
 0x433   :  { %v417_v53 = vpop.f32.mrb[2].mxu1 }
 0x434   :  { %v418_v54 = vadd.f32 %v617_v1, %v417_v53  ;;  %v752_v55 = vpop.f32.mrb[3].mxu1 }
 0x436   :  { %v421_v56 = vmax.f32 %v418_v54, 0.0 }
 0x438   :  { %770 = vmatmul.mubr.msk.f32.vlgmr.msra.gmra.mrb[4].mxu0 %vm47_vm1, %v421_v56 }
 0x50b   :  { %v504_v61 = vpop.f32.mrb[4].mxu0 }
 0x50c   :  { %v505_v0 = vadd.f32 %v619_v60, %v504_v61  ;;  %v771_v62 = vpop.f32.mrb[5].mxu0 }
 0x50e   :  { %v508_v63 = vmax.f32 %v505_v0, 0.0 }
 0x510   :  { %789 = vmatmul.mubr.msk.f32.vlgmr.msra.gmra.mrb[4].mxu1 %vm47_vm1, %v508_v63 }
 0x5e3   :  { %v591_v5 = vpop.f32.mrb[4].mxu1 }
 0x5e4   :  { %v592_v6 = vadd.f32 %v621_v3, %v591_v5  ;;  %v790_v7 = vpop.f32.mrb[5].mxu1 }
 0x5e6   :  { %v595_v8 = vmax.f32 %v592_v6, 0.0 }
 0x5e8   :  { %v600_v9 = vsel %vm599_vm2, %v334_v40, %v595_v8 }
 0x5e9   :  { %v601_v10 = vsel %vm598_vm3, %v979_v21, %v600_v9 }
 0x5ea   :  { %602 = vst [vmem:[%s1014_s2] sm:$0xff] %v601_v10 }
 0x5eb   :  { %607 = vsyncpa [#allocation3], 1 }

</bundles_post_ra>
